<compile_context>
chip_gen: v7x
topology: tpu7x:2x2x1
jax: 0.10.0
libtpu: 0.0.40
codegen_flags: <defaults>
</compile_context>

<pallas_src>
import functools

import jax
import jax.numpy as jnp
from jax.experimental import pallas as pl
from jax.experimental.pallas import tpu as pltpu


def _round_up(x, m):
    return ((x + m - 1) // m) * m


def _round_down(x, m):
    return (x // m) * m


def quantize_int8_rows(weight):
    """Symmetric per-output-row int8 quantization of a (V, D) weight."""
    absmax = jnp.max(jnp.abs(weight), axis=1)                   # (V,)
    scale = (absmax / 127.0).astype(jnp.float32)
    safe = jnp.where(scale > 0, scale, 1.0)
    q = jnp.clip(jnp.round(weight / safe[:, None]), -127, 127).astype(jnp.int8)
    return q, scale


def cbow_kernel(x_ref, w_ref, b_ref, s_ref, o_ref, m_ref, l_ref):
    """One vocab tile of the projection with online log-softmax stats.

    x_ref:  (B, D)        summed context embeddings (resident)
    w_ref:  (D, TILE_V)   pre-transposed weight tile (streamed; f32/bf16/int8)
    b_ref:  (1, Vp)       bias, f32 (resident; sliced with pl.ds)
    s_ref:  (1, Vp)       per-column dequant scales, f32 (resident)
    o_ref:  (B, TILE_V)   raw logits tile (pipelined, lane-dense writeback)
    m_ref:  (1, B, 1)     running max for this vocab split (resident)
    l_ref:  (1, B, 1)     running sum-exp for this vocab split (resident)
    """
    s = pl.program_id(0)                 # vocab split (parallel; a TC on v7x)
    j = pl.program_id(1)                 # tile within the split ("arbitrary")
    tiles_per_split = pl.num_programs(1)
    tile_v = w_ref.shape[1]

    # Per-split running-softmax state lives in the resident m/l output blocks.
    @pl.when(j == 0)
    def _():
        m_ref[...] = jnp.full_like(m_ref, -1e30)
        l_ref[...] = jnp.zeros_like(l_ref)

    # Streamed weight tile; int8 -> bf16 upcast is exact and VPU work is free
    # here (the kernel is HBM-bandwidth bound).
    w = w_ref[...]
    if w.dtype != x_ref.dtype:
        w = w.astype(x_ref.dtype)

    start = pl.multiple_of((s * tiles_per_split + j) * tile_v, tile_v)
    bias = b_ref[:, pl.ds(start, tile_v)]      # (1, tile_v)
    scale = s_ref[:, pl.ds(start, tile_v)]     # (1, tile_v)

    # Lane-dense (B, tile_v) logits off the MXU with f32 accumulation;
    # dequant scale applied after the matmul, then the bias.
    logits = jnp.dot(x_ref[...], w, preferred_element_type=jnp.float32)
    logits = logits * scale + bias
    o_ref[...] = logits.astype(o_ref.dtype)    # pipelined writeback of raw logits

    # Online (flash-style) log-softmax statistics for this split.
    m_old = m_ref[0]                                           # (B, 1)
    m_new = jnp.maximum(m_old, jnp.max(logits, axis=1, keepdims=True))
    l_ref[0] = l_ref[0] * jnp.exp(m_old - m_new) + jnp.sum(
        jnp.exp(logits - m_new), axis=1, keepdims=True)
    m_ref[0] = m_new


@functools.partial(jax.jit, static_argnames=("tile_v", "weight_dtype", "n_splits"))
def cbow_forward(inputs, emb_table, weight, bias, *, tile_v=4096,
                 weight_dtype=jnp.bfloat16, n_splits=2):
    """CBOW forward: log_softmax(sum(emb_table[inputs], 1) @ weight.T + bias).

    inputs: (B, C) int32; emb_table: (V, D); weight: (V, D); bias: (V,).
    weight_dtype in {float32, bfloat16, int8}; int8 uses per-row scales with
    dequantization after the MXU matmul.
    """
    B, C = inputs.shape
    V, D = weight.shape
    assert tile_v % 128 == 0 and tile_v >= 128, "vocab tile must be lane-aligned"

    compute_dtype = jnp.float32 if weight_dtype == jnp.float32 else jnp.bfloat16

    # Gather + context-sum: XLA fuses these; the kernel then only moves (B, D).
    x = jnp.sum(emb_table[inputs], axis=1).astype(compute_dtype)        # (B, D)

    # Pre-transpose once so the kernel consumes the weight lane-dense on V.
    if weight_dtype == jnp.int8:
        q, scale_v = quantize_int8_rows(weight)
        w_stream = q.T                                                   # (D, V) int8
    else:
        w_stream = weight.T.astype(weight_dtype)                         # (D, V)
        scale_v = jnp.ones((V,), jnp.float32)
    bias_f = bias.astype(jnp.float32)

    # Tile sizing: as large as useful (per-step overhead dominates small tiles),
    # capped so the double-buffered weight stream stays <= ~8 MiB of VMEM and
    # so tiny vocabularies are not over-padded.
    itemsize = jnp.dtype(w_stream.dtype).itemsize
    vmem_cap = max(128, _round_down((8 << 20) // (2 * D * itemsize), 128))
    need_cap = _round_up(-(-V // n_splits), 128)
    tile_v_eff = max(128, min(tile_v, vmem_cap, need_cap))

    Vp = _round_up(V, n_splits * tile_v_eff)
    pad = Vp - V
    if pad:
        w_stream = jnp.pad(w_stream, ((0, 0), (0, pad)))
        scale_v = jnp.pad(scale_v, (0, pad), constant_values=1.0)
        # -1e30 f32 bias => padded lanes contribute exp() == 0 to the normalizer.
        bias_f = jnp.pad(bias_f, (0, pad), constant_values=-1e30)
    b2d = bias_f.reshape(1, Vp)
    s2d = scale_v.reshape(1, Vp)

    tiles_per_split = Vp // (n_splits * tile_v_eff)

    logits, m_out, l_out = pl.pallas_call(
        cbow_kernel,
        out_shape=(
            jax.ShapeDtypeStruct((B, Vp), jnp.float32),           # raw logits
            jax.ShapeDtypeStruct((n_splits, B, 1), jnp.float32),  # per-split max
            jax.ShapeDtypeStruct((n_splits, B, 1), jnp.float32),  # per-split sum-exp
        ),
        grid=(n_splits, tiles_per_split),
        in_specs=[
            pl.BlockSpec((B, D), lambda s, j: (0, 0)),                 # resident x
            pl.BlockSpec((D, tile_v_eff),
                         lambda s, j: (0, s * tiles_per_split + j)),   # streamed W
            pl.BlockSpec((1, Vp), lambda s, j: (0, 0)),                # resident bias
            pl.BlockSpec((1, Vp), lambda s, j: (0, 0)),                # resident scales
        ],
        out_specs=(
            pl.BlockSpec((B, tile_v_eff),
                         lambda s, j: (0, s * tiles_per_split + j)),   # pipelined logits
            pl.BlockSpec((1, B, 1), lambda s, j: (s, 0, 0)),           # resident per split
            pl.BlockSpec((1, B, 1), lambda s, j: (s, 0, 0)),
        ),
        compiler_params=pltpu.CompilerParams(
            # Vocab splits are independent (dual-TC on v7x); the tile axis
            # carries the running-softmax state -> "arbitrary".
            dimension_semantics=("parallel", "arbitrary"),
        ),
    )(x, w_stream, b2d, s2d)

    # Combine the per-split (max, sum-exp) stats and apply the normalization;
    # this is O(B*V) elementwise work which XLA fuses with the final slice.
    m = m_out[:, :, 0]                                    # (n_splits, B)
    l = l_out[:, :, 0]
    gm = jnp.max(m, axis=0)                               # (B,)
    lse = gm + jnp.log(jnp.sum(l * jnp.exp(m - gm), axis=0))
    return logits[:, :V] - lse[:, None]


def reference_forward(inputs, emb_table, weight, bias, compute_dtype=jnp.float32):
    """Plain-JAX reference mirroring the PyTorch module (optionally with the
    matmul inputs at reduced precision, to check the bf16-streamed path)."""
    x = jnp.sum(emb_table[inputs], axis=1)
    logits = jnp.dot(x.astype(compute_dtype), weight.astype(compute_dtype).T,
                     preferred_element_type=jnp.float32) + bias
    return jax.nn.log_softmax(logits, axis=1)


if __name__ == "__main__":
    # Small, TPU-friendly shapes consistent with the module.  V is deliberately
    # not a multiple of 128 so vocab padding is exercised.
    vocab_size = 250
    embedding_dim = 128
    window_size = 2
    context_len = 2 * window_size
    batch = 8

    key = jax.random.PRNGKey(0)
    k_emb, k_w, k_b, k_idx = jax.random.split(key, 4)

    # Parameter init mirroring PyTorch defaults:
    #   nn.Embedding -> N(0, 1); nn.Linear -> U(-1/sqrt(fan_in), 1/sqrt(fan_in)).
    emb_table = jax.random.normal(k_emb, (vocab_size, embedding_dim), dtype=jnp.float32)
    bound = 1.0 / (embedding_dim ** 0.5)
    weight = jax.random.uniform(k_w, (vocab_size, embedding_dim),
                                minval=-bound, maxval=bound, dtype=jnp.float32)
    bias = jax.random.uniform(k_b, (vocab_size,),
                              minval=-bound, maxval=bound, dtype=jnp.float32)
    inputs = jax.random.randint(k_idx, (batch, context_len), 0, vocab_size,
                                dtype=jnp.int32)

    # 1) f32 weights, single split, 2 vocab tiles: exercises the online
    #    (flash-style) log-softmax accumulation across tiles; bit-tight check.
    out_f32 = jax.block_until_ready(
        cbow_forward(inputs, emb_table, weight, bias,
                     tile_v=128, weight_dtype=jnp.float32, n_splits=1))
    ref_f32 = reference_forward(inputs, emb_table, weight, bias)
    assert out_f32.shape == (batch, vocab_size)
    assert bool(jnp.allclose(out_f32, ref_f32, atol=1e-4, rtol=1e-4)), "f32 path mismatch"

    # 2) Default path: bf16-streamed weights (f32 MXU accumulation), 2-way
    #    vocab split (dual-TC-ready on v7x), exercises padding + the
    #    cross-split stat combine in the wrapper.
    out_bf16 = jax.block_until_ready(cbow_forward(inputs, emb_table, weight, bias))
    ref_bf16 = reference_forward(inputs, emb_table, weight, bias,
                                 compute_dtype=jnp.bfloat16)
    assert out_bf16.shape == (batch, vocab_size)
    assert bool(jnp.allclose(out_bf16, ref_bf16, atol=1e-3, rtol=1e-3)), "bf16 path mismatch"

    # 3) int8-streamed weights (per-row scales, dequant after the MXU matmul):
    #    halves the dominant weight HBM stream on v5e/v6e.
    out_i8 = jax.block_until_ready(
        cbow_forward(inputs, emb_table, weight, bias, weight_dtype=jnp.int8))
    q, scale_v = quantize_int8_rows(weight)
    x_bf = jnp.sum(emb_table[inputs], axis=1).astype(jnp.bfloat16)
    ref_i8 = jax.nn.log_softmax(
        jnp.dot(x_bf, q.astype(jnp.bfloat16).T,
                preferred_element_type=jnp.float32) * scale_v + bias, axis=1)
    assert out_i8.shape == (batch, vocab_size)
    assert bool(jnp.allclose(out_i8, ref_i8, atol=2e-3, rtol=2e-3)), "int8 path mismatch"

    print("KERNEL_OK")
</pallas_src>

<mosaic_0001>
module attributes {stable_mosaic.version = 11 : i64} {
  func.func @cbow_kernel(%arg0: i32, %arg1: i32, %arg2: memref<8x128xf32, #tpu.memory_space<vmem>>, %arg3: memref<128x128xf32, #tpu.memory_space<vmem>>, %arg4: memref<1x256xf32, #tpu.memory_space<vmem>>, %arg5: memref<1x256xf32, #tpu.memory_space<vmem>>, %arg6: memref<8x128xf32, #tpu.memory_space<vmem>>, %arg7: memref<1x8x1xf32, #tpu.memory_space<vmem>>, %arg8: memref<1x8x1xf32, #tpu.memory_space<vmem>>) attributes {dimension_semantics = [#tpu.dimension_semantics<parallel>, #tpu.dimension_semantics<arbitrary>], iteration_bounds = array<i64: 1, 2>, scalar_prefetch = 0 : i64, scratch_operands = 0 : i64, tpu.core_type = #tpu.core_type<tc>, window_params = [{pipeline_mode = #tpu.pipeline_mode<synchronous>, transform_indices = @transform_0, window_bounds = array<i64: 8, 128>}, {transform_indices = @transform_1, window_bounds = array<i64: 128, 128>}, {pipeline_mode = #tpu.pipeline_mode<synchronous>, transform_indices = @transform_2, window_bounds = array<i64: 1, 256>}, {pipeline_mode = #tpu.pipeline_mode<synchronous>, transform_indices = @transform_3, window_bounds = array<i64: 1, 256>}, {transform_indices = @transform_4, window_bounds = array<i64: 8, 128>}, {transform_indices = @transform_5, window_bounds = array<i64: 1, 8, 1>}, {transform_indices = @transform_6, window_bounds = array<i64: 1, 8, 1>}]} {
    %c0_i32 = arith.constant 0 : i32
    %0 = arith.cmpi eq, %arg1, %c0_i32 : i32
    %1 = arith.extui %0 : i1 to i32
    %c0_i32_0 = arith.constant 0 : i32
    %2 = arith.cmpi ne, %1, %c0_i32_0 : i32
    scf.if %2 {
      %cst_22 = arith.constant -1.000000e+30 : f32
      %41 = vector.broadcast %cst_22 : f32 to vector<1x8x1xf32>
      %c0_23 = arith.constant 0 : index
      %c0_24 = arith.constant 0 : index
      %c0_25 = arith.constant 0 : index
      %42 = vector.load %arg7[%c0_23, %c0_24, %c0_25] : memref<1x8x1xf32, #tpu.memory_space<vmem>>, vector<1x8x1xf32>
      tpu.vector_store %arg7[%c0_23, %c0_24, %c0_25], %41 {strides = array<i32>} : memref<1x8x1xf32, #tpu.memory_space<vmem>>, vector<1x8x1xf32>,
      %cst_26 = arith.constant 0.000000e+00 : f32
      %43 = vector.broadcast %cst_26 : f32 to vector<1x8x1xf32>
      %c0_27 = arith.constant 0 : index
      %c0_28 = arith.constant 0 : index
      %c0_29 = arith.constant 0 : index
      %44 = vector.load %arg8[%c0_27, %c0_28, %c0_29] : memref<1x8x1xf32, #tpu.memory_space<vmem>>, vector<1x8x1xf32>
      tpu.vector_store %arg8[%c0_27, %c0_28, %c0_29], %43 {strides = array<i32>} : memref<1x8x1xf32, #tpu.memory_space<vmem>>, vector<1x8x1xf32>,
    } else {
    }
    %c0 = arith.constant 0 : index
    %c0_1 = arith.constant 0 : index
    %3 = vector.load %arg3[%c0, %c0_1] : memref<128x128xf32, #tpu.memory_space<vmem>>, vector<128x128xf32>
    %c2_i32 = arith.constant 2 : i32
    %4 = arith.muli %arg0, %c2_i32 : i32
    %5 = arith.addi %4, %arg1 : i32
    %c128_i32 = arith.constant 128 : i32
    %6 = arith.muli %5, %c128_i32 : i32
    %7 = tpu.assume_multiple %6, 128 : i32
    %c0_2 = arith.constant 0 : index
    %8 = arith.index_cast %7 : i32 to index
    %9 = vector.load %arg4[%c0_2, %8] : memref<1x256xf32, #tpu.memory_space<vmem>>, vector<1x128xf32>
    %c0_3 = arith.constant 0 : index
    %10 = arith.index_cast %7 : i32 to index
    %11 = vector.load %arg5[%c0_3, %10] : memref<1x256xf32, #tpu.memory_space<vmem>>, vector<1x128xf32>
    %c0_4 = arith.constant 0 : index
    %c0_5 = arith.constant 0 : index
    %12 = vector.load %arg2[%c0_4, %c0_5] : memref<8x128xf32, #tpu.memory_space<vmem>>, vector<8x128xf32>
    %cst = arith.constant dense<0.000000e+00> : vector<8x128xf32>
    %13 = tpu.matmul %12, %3, %cst {dimension_numbers = #tpu.dot_dimension_numbers<[1], [0], [0], [1], [0, 0, 1, 1], [], []>} : vector<8x128xf32>, vector<128x128xf32>, vector<8x128xf32> -> vector<8x128xf32>
    %14 = vector.broadcast %11 : vector<1x128xf32> to vector<8x128xf32>
    %15 = arith.mulf %13, %14 : vector<8x128xf32>
    %16 = vector.broadcast %9 : vector<1x128xf32> to vector<8x128xf32>
    %17 = arith.addf %15, %16 : vector<8x128xf32>
    %c0_6 = arith.constant 0 : index
    %c0_7 = arith.constant 0 : index
    %18 = vector.load %arg6[%c0_6, %c0_7] : memref<8x128xf32, #tpu.memory_space<vmem>>, vector<8x128xf32>
    tpu.vector_store %arg6[%c0_6, %c0_7], %17 {strides = array<i32>} : memref<8x128xf32, #tpu.memory_space<vmem>>, vector<8x128xf32>,
    %c0_8 = arith.constant 0 : index
    %c0_9 = arith.constant 0 : index
    %c0_10 = arith.constant 0 : index
    %19 = vector.load %arg7[%c0_8, %c0_9, %c0_10] : memref<1x8x1xf32, #tpu.memory_space<vmem>>, vector<1x8x1xf32>
    %20 = vector.shape_cast %19 : vector<1x8x1xf32> to vector<8x1xf32>
    %cst_11 = arith.constant dense<0xFF800000> : vector<8xf32>
    %21 = vector.multi_reduction <maximumf>, %17, %cst_11 [1] : vector<8x128xf32> to vector<8xf32>
    %22 = vector.shape_cast %21 : vector<8xf32> to vector<8x1xf32>
    %23 = arith.maximumf %20, %22 : vector<8x1xf32>
    %c0_12 = arith.constant 0 : index
    %c0_13 = arith.constant 0 : index
    %c0_14 = arith.constant 0 : index
    %24 = vector.load %arg8[%c0_12, %c0_13, %c0_14] : memref<1x8x1xf32, #tpu.memory_space<vmem>>, vector<1x8x1xf32>
    %25 = vector.shape_cast %24 : vector<1x8x1xf32> to vector<8x1xf32>
    %26 = arith.subf %20, %23 : vector<8x1xf32>
    %27 = math.exp %26 : vector<8x1xf32>
    %28 = arith.mulf %25, %27 : vector<8x1xf32>
    %29 = vector.broadcast %23 : vector<8x1xf32> to vector<8x128xf32>
    %30 = arith.subf %17, %29 : vector<8x128xf32>
    %31 = math.exp %30 : vector<8x128xf32>
    %cst_15 = arith.constant dense<0.000000e+00> : vector<8xf32>
    %32 = vector.multi_reduction <add>, %31, %cst_15 [1] : vector<8x128xf32> to vector<8xf32>
    %33 = vector.shape_cast %32 : vector<8xf32> to vector<8x1xf32>
    %34 = arith.addf %28, %33 : vector<8x1xf32>
    %c0_16 = arith.constant 0 : index
    %c0_17 = arith.constant 0 : index
    %c0_18 = arith.constant 0 : index
    %35 = vector.load %arg8[%c0_16, %c0_17, %c0_18] : memref<1x8x1xf32, #tpu.memory_space<vmem>>, vector<1x8x1xf32>
    %36 = vector.shape_cast %35 : vector<1x8x1xf32> to vector<8x1xf32>
    %37 = vector.shape_cast %34 : vector<8x1xf32> to vector<1x8x1xf32>
    tpu.vector_store %arg8[%c0_16, %c0_17, %c0_18], %37 {strides = array<i32>} : memref<1x8x1xf32, #tpu.memory_space<vmem>>, vector<1x8x1xf32>,
    %c0_19 = arith.constant 0 : index
    %c0_20 = arith.constant 0 : index
    %c0_21 = arith.constant 0 : index
    %38 = vector.load %arg7[%c0_19, %c0_20, %c0_21] : memref<1x8x1xf32, #tpu.memory_space<vmem>>, vector<1x8x1xf32>
    %39 = vector.shape_cast %38 : vector<1x8x1xf32> to vector<8x1xf32>
    %40 = vector.shape_cast %23 : vector<8x1xf32> to vector<1x8x1xf32>
    tpu.vector_store %arg7[%c0_19, %c0_20, %c0_21], %40 {strides = array<i32>} : memref<1x8x1xf32, #tpu.memory_space<vmem>>, vector<1x8x1xf32>,
    return
  }
  func.func @transform_0(%arg0: i32, %arg1: i32) -> (i32, i32) {
    %c0_i32 = arith.constant 0 : i32
    %c0_i32_0 = arith.constant 0 : i32
    %c0_i32_1 = arith.constant 0 : i32
    return %c0_i32, %c0_i32_0 : i32, i32
  }
  func.func @transform_1(%arg0: i32, %arg1: i32) -> (i32, i32) {
    %c2_i32 = arith.constant 2 : i32
    %0 = arith.muli %arg0, %c2_i32 : i32
    %1 = arith.addi %0, %arg1 : i32
    %c0_i32 = arith.constant 0 : i32
    %c0_i32_0 = arith.constant 0 : i32
    return %c0_i32, %1 : i32, i32
  }
  func.func @transform_2(%arg0: i32, %arg1: i32) -> (i32, i32) {
    %c0_i32 = arith.constant 0 : i32
    %c0_i32_0 = arith.constant 0 : i32
    %c0_i32_1 = arith.constant 0 : i32
    return %c0_i32, %c0_i32_0 : i32, i32
  }
  func.func @transform_3(%arg0: i32, %arg1: i32) -> (i32, i32) {
    %c0_i32 = arith.constant 0 : i32
    %c0_i32_0 = arith.constant 0 : i32
    %c0_i32_1 = arith.constant 0 : i32
    return %c0_i32, %c0_i32_0 : i32, i32
  }
  func.func @transform_4(%arg0: i32, %arg1: i32) -> (i32, i32) {
    %c2_i32 = arith.constant 2 : i32
    %0 = arith.muli %arg0, %c2_i32 : i32
    %1 = arith.addi %0, %arg1 : i32
    %c0_i32 = arith.constant 0 : i32
    %c0_i32_0 = arith.constant 0 : i32
    return %c0_i32, %1 : i32, i32
  }
  func.func @transform_5(%arg0: i32, %arg1: i32) -> (i32, i32, i32) {
    %c0_i32 = arith.constant 0 : i32
    %c0_i32_0 = arith.constant 0 : i32
    %c0_i32_1 = arith.constant 0 : i32
    return %arg0, %c0_i32, %c0_i32_0 : i32, i32, i32
  }
  func.func @transform_6(%arg0: i32, %arg1: i32) -> (i32, i32, i32) {
    %c0_i32 = arith.constant 0 : i32
    %c0_i32_0 = arith.constant 0 : i32
    %c0_i32_1 = arith.constant 0 : i32
    return %arg0, %c0_i32, %c0_i32_0 : i32, i32, i32
  }
}

</mosaic_0001>

<bundles_post_ra>
// kernel: cbow_forward.1
= control target key start
LH: loop header
LB: loop body
LE: loop exit
PB: predicated region body
PF: predicated region fallthrough
CT: control target
= control target key end

     0   :  { %s895_s21 = smov 0   ;;  %s897_s22 = smov 0   ;;  %s1031_s0 = inlined_call_operand.vmem [shape: f32[8,128], index: 0, kind: input, shape index: {}]   ;;  %s1032_s1 = inlined_call_operand.vmem [shape: f32[128,256], index: 1, kind: input, shape index: {}]   ;;  %s1033_s2 = inlined_call_operand.vmem [shape: f32[1,256], index: 2, kind: input, shape index: {}]   ;;  %s1034_s3 = inlined_call_operand.vmem [shape: f32[1,256], index: 3, kind: input, shape index: {}]   ;;  %s1035_s4 = inlined_call_operand.vmem [shape: f32[8,256], index: 4, kind: output, shape index: {0}]   ;;  %s1036_s5 = inlined_call_operand.vmem [shape: f32[1,8,1], index: 5, kind: output, shape index: {1}]   ;;  %s1037_s6 = inlined_call_operand.vmem [shape: f32[1,8,1], index: 6, kind: output, shape index: {2}]  }
   0x1   :  { %s899_s23 = smov 0   ;;  %s901_s24 = smov 0  }
   0x2   :  { %s903_s25 = smov 0  }
   0x3 LB: > { %s26_s26 = sadd.s32 1, %s848_s24  ;;  %p68_p1 = scmp.ne.s32.totalorder %s840_s22, %s836_s21  ;;  %s852_s25 = sphi %s903_s25, %s17_s25   ;;  %s848_s24 = sphi %s901_s24, %s1041_s24   ;;  %s844_s23 = sphi %s899_s23, %s1040_s23   ;;  %s840_s22 = sphi %s897_s22, %s1039_s22   ;;  %s836_s21 = sphi %s895_s21, %s1038_s21  }
   0x4   : > { %p27_p0 = scmp.ge.s32.totalorder %s26_s26, 2  ;;  %p69_p2 = scmp.eq.s32.totalorder %s852_s25, 0 }
   0x5   : > { %s61_s28 = sadd.s32 1, %s840_s22  ;;  %p673_p5 = scmp.ge.s32.totalorder %s852_s25, 2 }
   0x6   : > { %s1043_s26 = smov (%p27_p0, %s26_s26), 0  ;;  %p70_p3 = por %p69_p2, %p68_p1 }
   0x7   : > { %s58_s27 = ssub.s32 %s848_s24, %s1043_s26  ;;  %227 = sbr.rel (%p673_p5) target bundleno = 26 (0x1a), region = 28 }
   0x8   : > { %p59_p4 = scmp.eq.s32.totalorder %s58_s27, 0 }
   0xa   : > { %s930_s29 = scalar_select %p59_p4, %s840_s22, %s61_s28  }
   0xe   : > { %230 = sbr.rel (!%p70_p3) target bundleno = 26 (0x1a), region = 32  ;;  %s232_s30 = sand.u32 (%p70_p3), 1, %s840_s22  }
   0xf   : > { %s675_s7 = sshll.u32 (%p70_p3), %s848_s24, 3  ;;  %s674_s8 = sshll.u32 (%p70_p3), %s232_s30, 7 }
  0x10   : > { %s938_s11 = scalar_lea.vmem (%p70_p3), %s1032_s1, %s675_s7  ;;  %s234_s12 = scalar_lea.vmem (%p70_p3), [#allocation2], %s674_s8 }
  0x11   : > { %v296_v0 = vld [vmem:[%s938_s11] sm:$0xff] (%p70_p3)  ;;  %v298_v1 = vld [vmem:[%s938_s11 + $0x10] sm:$0xff] (%p70_p3) }
  0x12   : > { %v300_v2 = vld [vmem:[%s938_s11 + $0x20] sm:$0xff] (%p70_p3)  ;;  %297 = vst [vmem:[%s234_s12] sm:$0xff] (%p70_p3), %v296_v0  ;;  %299 = vst [vmem:[%s234_s12 + $0x8] sm:$0xff] (%p70_p3), %v298_v1  ;;  %v302_v3 = vld [vmem:[%s938_s11 + $0x30] sm:$0xff] (%p70_p3) }
  0x13   : > { %301 = vst [vmem:[%s234_s12 + $0x10] sm:$0xff] (%p70_p3), %v300_v2  ;;  %v304_v4 = vld [vmem:[%s938_s11 + $0x40] sm:$0xff] (%p70_p3)  ;;  %v306_v5 = vld [vmem:[%s938_s11 + $0x50] sm:$0xff] (%p70_p3)  ;;  %303 = vst [vmem:[%s234_s12 + $0x18] sm:$0xff] (%p70_p3), %v302_v3 }
  0x14   : > { %305 = vst [vmem:[%s234_s12 + $0x20] sm:$0xff] (%p70_p3), %v304_v4  ;;  %307 = vst [vmem:[%s234_s12 + $0x28] sm:$0xff] (%p70_p3), %v306_v5  ;;  %v308_v6 = vld [vmem:[%s938_s11 + $0x60] sm:$0xff] (%p70_p3)  ;;  %v310_v7 = vld [vmem:[%s938_s11 + $0x70] sm:$0xff] (%p70_p3) }
  0x15   : > { %v312_v8 = vld [vmem:[%s938_s11 + $0x80] sm:$0xff]  ;;  %309 = vst [vmem:[%s234_s12 + $0x30] sm:$0xff] %v308_v6  ;;  %311 = vst [vmem:[%s234_s12 + $0x38] sm:$0xff] %v310_v7  ;;  %v314_v9 = vld [vmem:[%s938_s11 + $0x90] sm:$0xff] }
  0x16   : > { %313 = vst [vmem:[%s234_s12 + $0x40] sm:$0xff] %v312_v8  ;;  %v316_v10 = vld [vmem:[%s938_s11 + $0xa0] sm:$0xff]  ;;  %v318_v11 = vld [vmem:[%s938_s11 + $0xb0] sm:$0xff]  ;;  %315 = vst [vmem:[%s234_s12 + $0x48] sm:$0xff] %v314_v9 }
  0x17   : > { %317 = vst [vmem:[%s234_s12 + $0x50] sm:$0xff] %v316_v10  ;;  %319 = vst [vmem:[%s234_s12 + $0x58] sm:$0xff] %v318_v11  ;;  %v320_v12 = vld [vmem:[%s938_s11 + $0xc0] sm:$0xff]  ;;  %v322_v13 = vld [vmem:[%s938_s11 + $0xd0] sm:$0xff] }
  0x18   : > { %v324_v14 = vld [vmem:[%s938_s11 + $0xe0] sm:$0xff]  ;;  %321 = vst [vmem:[%s234_s12 + $0x60] sm:$0xff] %v320_v12  ;;  %323 = vst [vmem:[%s234_s12 + $0x68] sm:$0xff] %v322_v13  ;;  %v326_v15 = vld [vmem:[%s938_s11 + $0xf0] sm:$0xff] }
  0x19   : > { %325 = vst [vmem:[%s234_s12 + $0x70] sm:$0xff] %v324_v14  ;;  %327 = vst [vmem:[%s234_s12 + $0x78] sm:$0xff] %v326_v15 }
  0x1a PF: > { %p676_p6 = scmp.ge.s32.totalorder %s852_s25, 1  ;;  %p332_p7 = scmp.lt.s32.totalorder %s852_s25, 3 }
  0x1c   : > { %p333_p8 = pnand %p676_p6, %p332_p7 }
  0x1d   : > { %s339_s13 = sand.u32 (!%p333_p8), 1, %s836_s21   ;;  %p381_p9 = scmp.lt.s32.totalorder (!%p333_p8), %s844_s23, 1 }
  0x1e   : > { %336 = sbr.rel (%p333_p8) target bundleno = 727 (0x2d7), region = 70  ;;  %s677_s14 = sshll.u32 (!%p333_p8), %s339_s13, 7 }
  0x1f   : > { %s966_s20 = scalar_lea.vmem (!%p333_p8), [#allocation2], %s677_s14  ;;  %p679_p10 = scmp.ne.s32.totalorder (!%p333_p8), %s844_s23, 0 }
  0x25   : > { %s382_s15 = scalar_select %p381_p9, %s844_s23, 1 }
  0x26   : > { %398 = sbr.rel (%p679_p10) target bundleno = 45 (0x2d), region = 78  ;;  %vm399_vm0 = vcmask (!%p679_p10), 7168   ;;  %v854_v16 = vmov (!%p679_p10), -1e+30   ;;  %v855_v17 = vmov (!%p679_p10), 0.0  }
  0x27   : > { %s678_s16 = sshll.u32 %s382_s15, 3  ;;  %400 = vst.msk [vmem:[%s1036_s5] sm:$0xff] (!%p679_p10), %vm399_vm0, %v854_v16  ;;  %401 = vst.msk [vmem:[%s1037_s6] sm:$0xff] (!%p679_p10), %vm399_vm0, %v855_v17 }
  0x28   : > { %s964_s19 = scalar_lea.vmem %s1035_s4, %s678_s16 }
  0x2d PF: > { %v402_v18 = vld [vmem:[%s966_s20] sm:$0xff]  ;;  %v403_v19 = vld [vmem:[%s966_s20 + $0x8] sm:$0xff]  ;;  %v404_v20 = vld [vmem:[%s966_s20 + $0x10] sm:$0xff]  ;;  %v856_v21 = vmov 0.0|0.0   ;;  %vm857_vm1 = vmmov 0   ;;  %v858_v24 = vmov 0.0  }
  0x2e   : > { %739 = vmatprep.subr.bf16.mxu0 %v856_v21  ;;  %v740_v22 = vpack.c.bf16 %v403_v19, %v402_v18  ;;  %v405_v23 = vld [vmem:[%s966_s20 + $0x18] sm:$0xff]  ;;  %736 = vmatprep.mubr.msk.f32.mxu0 %vm857_vm1, %v858_v24  ;;  %v406_v26 = vld [vmem:[%s966_s20 + $0x20] sm:$0xff]  ;;  %v407_v27 = vld [vmem:[%s966_s20 + $0x28] sm:$0xff]  ;;  %s680_s9 = sshll.u32 %s844_s23, 7  ;;  %v859_v51 = vmov 0   ;;  %vm533_vm2 = vcmask 7168  }
  0x2f   : > { %v743_v25 = vpack.c.bf16 %v405_v23, %v404_v20  ;;  %v746_v28 = vpack.c.bf16 %v407_v27, %v406_v26  ;;  %v408_v29 = vld [vmem:[%s966_s20 + $0x30] sm:$0xff]  ;;  %v409_v30 = vld [vmem:[%s966_s20 + $0x38] sm:$0xff]  ;;  %v410_v32 = vld [vmem:[%s966_s20 + $0x40] sm:$0xff]  ;;  %s421_s10 = sshra.s32 %s680_s9, 7  ;;  %809 = vset.pattern.permute.xlu0 %v859_v51 }
  0x30   : > { %741 = vmatpush3.bf16.msra.mxu0 %v740_v22  ;;  %v749_v31 = vpack.c.bf16 %v409_v30, %v408_v29  ;;  %v411_v33 = vld [vmem:[%s966_s20 + $0x48] sm:$0xff]  ;;  %v412_v35 = vld [vmem:[%s966_s20 + $0x50] sm:$0xff]  ;;  %v413_v36 = vld [vmem:[%s966_s20 + $0x58] sm:$0xff]  ;;  %s425_s13 = scalar_lea.vmem %s1034_s3, %s421_s10  ;;  %s423_s16 = scalar_lea.vmem %s1033_s2, %s421_s10 }
  0x31   : > { %742 = vmatprep.subr.bf16.mxu0 %v856_v21  ;;  %v752_v34 = vpack.c.bf16 %v411_v33, %v410_v32  ;;  %v755_v37 = vpack.c.bf16 %v413_v36, %v412_v35  ;;  %v414_v38 = vld [vmem:[%s966_s20 + $0x60] sm:$0xff]  ;;  %v415_v39 = vld [vmem:[%s966_s20 + $0x68] sm:$0xff]  ;;  %v416_v41 = vld [vmem:[%s966_s20 + $0x70] sm:$0xff] }
  0x32   : > { %v758_v40 = vpack.c.bf16 %v415_v39, %v414_v38  ;;  %v417_v42 = vld [vmem:[%s966_s20 + $0x78] sm:$0xff]  ;;  %v427_v44 = vld [vmem:[%s1031_s0] sm:$0xff] }
  0x33   : > { %v761_v43 = vpack.c.bf16 %v417_v42, %v416_v41  ;;  %v681_v45 = vld [vmem:[%s425_s13] ss:$0 sm:$0xff] }
  0x34   : > { %744 = vmatpush3.bf16.msra.mxu0 %v743_v25  ;;  %v682_v46 = vld [vmem:[%s423_s16] ss:$0 sm:$0xff] }
  0x35   : > { %745 = vmatprep.subr.bf16.mxu0 %v856_v21  ;;  %v513_v52 = vld [vmem:[%s1036_s5] sm:$0xff] }
  0x36   : > { %v517_v62 = vld [vmem:[%s1037_s6] sm:$0xff] }
  0x38   : > { %747 = vmatpush3.bf16.msra.mxu0 %v746_v28 }
  0x39   : > { %748 = vmatprep.subr.bf16.mxu0 %v856_v21 }
  0x3c   : > { %750 = vmatpush3.bf16.msra.mxu0 %v749_v31 }
  0x3d   : > { %751 = vmatprep.subr.bf16.mxu0 %v856_v21 }
  0x40   : > { %753 = vmatpush3.bf16.msra.mxu0 %v752_v34 }
  0x41   : > { %754 = vmatprep.subr.bf16.mxu0 %v856_v21 }
  0x44   : > { %756 = vmatpush3.bf16.msra.mxu0 %v755_v37 }
  0x45   : > { %757 = vmatprep.subr.bf16.mxu0 %v856_v21 }
  0x48   : > { %759 = vmatpush3.bf16.msra.mxu0 %v758_v40 }
  0x49   : > { %760 = vmatprep.subr.bf16.mxu0 %v856_v21 }
  0x4c   : > { %762 = vmatpush3.bf16.msra.mxu0 %v761_v43 }
  0x4f   : > { %737 = vmatmul.mubr.f32.vlgmr.msra.gmra.mrb[0].mxu0 %v427_v44 }
 0x122   : > { %v494_v47 = vpop.f32.mrb[0].mxu0 }
 0x123   : > { %v504_v48 = vmul.f32 %v681_v45, %v494_v47  ;;  %v738_v49 = vpop.f32.mrb[1].mxu0 }
 0x125   : > { %v511_v50 = vadd.f32 %v682_v46, %v504_v48 }
 0x127   : > { %512 = vst [vmem:[%s964_s19] sm:$0xff] %v511_v50  ;;  %514 = vmax.xlane.f32.xlu0 %v511_v50 }
 0x1b4   : > { %v515_v53 = vpop.xlane.xlu0 %514 }
 0x1b5   : > { %v516_v54 = vmax.f32 %v513_v52, %v515_v53 }
 0x1b7   : > { %v518_v55 = vsub.f32 %v513_v52, %v516_v54  ;;  %535 = vst.msk [vmem:[%s1036_s5] sm:$0xff] %vm533_vm2, %v516_v54  ;;  %524 = vperm.xlu0 %809, %v516_v54  }
 0x1b9   : > { %v519_v60 = vmul.f32 1.442695, %v518_v55 }
 0x236   : > { %v525_v56 = vpop.permute.xlu0 %524 }
 0x237   : > { %v527_v57 = vsub.f32 %v511_v50, %v525_v56 }
 0x239   : > { %v528_v58 = vmul.f32 1.442695, %v527_v57 }
 0x23b   : > { %810 = vpow2.f32 %v528_v58 }
 0x23c   : > { %812 = vpow2.f32 %v519_v60 }
 0x245   : > { %v811_v59 = vpop.eup %810 }
 0x246   : > { %530 = vadd.xlane.f32.xlu1 %v811_v59  ;;  %v813_v61 = vpop.eup %812 }
 0x247   : > { %v521_v63 = vmul.f32 %v813_v61, %v517_v62 }
 0x2d3   : > { %v531_v0 = vpop.xlane.xlu1 %530 }
 0x2d4   : > { %v532_v1 = vadd.f32 %v531_v0, %v521_v63 }
 0x2d6   : > { %534 = vst.msk [vmem:[%s1037_s6] sm:$0xff] %vm533_vm2, %v532_v1 }
 0x2d7 PF: > { %s17_s25 = sadd.s32 1, %s852_s25   ;;  %s1038_s21 = smov %s840_s22 }
 0x2d8   : > { %p14_p11 = scmp.ge.s32.totalorder %s17_s25, 4   ;;  %s1039_s22 = smov %s930_s29 }
 0x2d9   : > { %s1040_s23 = smov %s848_s24  ;;  %s1041_s24 = smov %s1043_s26 }
 0x2da   :  { %16 = sbr.rel (!%p14_p11) target bundleno = 3 (0x3), region = 139 }

</bundles_post_ra>
